<compile_context>
chip_gen: v5e
topology: v5e:2x2
jax: 0.10.0
libtpu: 0.0.40
codegen_flags: <defaults>
</compile_context>

<pallas_src>
import jax
import jax.numpy as jnp
from jax.experimental import pallas as pl
from jax.experimental.pallas import tpu as pltpu

N_IN = 512    # input features
N_HID = 128   # hidden features
N_OUT = 33    # output features (written directly, no lane padding)


def _round_up(n, m):
    return ((n + m - 1) // m) * m


def _mlp_kernel(x_ref, w1_ref, b1_ref, w2_ref, b2_ref, o_ref):
    # x_ref:  (TB, 512) f32   w1_ref: (512, 128) bf16   b1_ref: (1, 128) f32
    # w2_ref: (128, 33) bf16  b2_ref: (1, 33) f32       o_ref:  (TB, 33) f32
    #
    # Cast x to the MXU dtype in-kernel (no separate wrapper astype pass).
    x = x_ref[...].astype(w1_ref.dtype)
    # First linear (MXU, f32 accumulation) + bias (VPU, f32).
    h = jnp.dot(x, w1_ref[...], preferred_element_type=jnp.float32) + b1_ref[...]
    # ReLU (VPU).
    h = jnp.maximum(h, 0.0)
    # Dropout(p=0.1) -> identity at inference time.
    # TODO(synk): training-mode dropout (pltpu.prng_seed + prng_random_bits mask
    #             with 1/(1-p) scaling) not emitted.
    # Second linear (MXU, f32 accumulation) + bias; store the true 33-wide
    # result directly (masked vst, but the kernel is x-DMA bound).
    out = jnp.dot(h.astype(w2_ref.dtype), w2_ref[...],
                  preferred_element_type=jnp.float32) + b2_ref[...]
    o_ref[...] = out.astype(o_ref.dtype)


def my_res_model_forward(x, w1, b1, w2, b2, *, tile_b=2048, use_bf16=True):
    """x: (B, 512) float32 -> (B, 33) float32.

    w1: (512, 128), b1: (1, 128), w2: (128, 33), b2: (1, 33)  (weights stored
    transposed relative to torch's (out, in) layout).
    """
    B = x.shape[0]
    out_dtype = x.dtype

    # Only the tiny weights are pre-cast; x is cast in-kernel.
    if use_bf16:
        w1k = w1.astype(jnp.bfloat16)
        w2k = w2.astype(jnp.bfloat16)
    else:
        w1k, w2k = w1, w2
    b1k = b1.astype(jnp.float32).reshape(1, N_HID)
    b2k = b2.astype(jnp.float32).reshape(1, N_OUT)

    # --- Batch tile selection -----------------------------------------------
    # * multiple of 16 (bf16 sublane packing of the in-kernel intermediates)
    # * capped at ceil(B/2) so the grid has >= 2 steps for v7x megacore
    # * capped at round_up(B, 8) so tiny batches don't over-allocate
    tile_req = max(16, _round_up(tile_b, 16))
    half = _round_up(pl.cdiv(B, 2), 16)
    TB = max(8, min(tile_req, half, _round_up(B, 8)))
    grid = (pl.cdiv(B, TB),)   # partial last block handled by Pallas (no pad)

    cost = pl.CostEstimate(
        flops=2 * B * (N_IN * N_HID + N_HID * N_OUT),
        transcendentals=0,
        bytes_accessed=int(
            B * N_IN * x.dtype.itemsize            # x stream
            + w1k.size * w1k.dtype.itemsize        # weights (resident)
            + w2k.size * w2k.dtype.itemsize
            + b1k.size * 4 + b2k.size * 4
            + B * N_OUT * 4                        # output writeback
        ),
    )

    out = pl.pallas_call(
        _mlp_kernel,
        out_shape=jax.ShapeDtypeStruct((B, N_OUT), out_dtype),
        grid=grid,
        in_specs=[
            # x: streamed / double-buffered per batch tile (native dtype).
            pl.BlockSpec((TB, N_IN), lambda i: (i, 0)),
            # Weights & biases: same block every step -> resident in VMEM.
            pl.BlockSpec((N_IN, N_HID), lambda i: (0, 0)),
            pl.BlockSpec((1, N_HID), lambda i: (0, 0)),
            pl.BlockSpec((N_HID, N_OUT), lambda i: (0, 0)),
            pl.BlockSpec((1, N_OUT), lambda i: (0, 0)),
        ],
        out_specs=pl.BlockSpec((TB, N_OUT), lambda i: (i, 0)),
        compiler_params=pltpu.CompilerParams(
            dimension_semantics=("parallel",),      # megacore sharding on v7x
            vmem_limit_bytes=64 * 1024 * 1024,      # headroom above v5e's 16 MiB default
        ),
        cost_estimate=cost,
    )(x, w1k, b1k, w2k, b2k)

    return out


def init_params(key):
    """Deterministic parameter init mirroring nn.Linear default (Kaiming-uniform-ish)."""
    k1, k2, k3, k4 = jax.random.split(key, 4)
    # Linear(512, 128): torch weight (128, 512) -> stored transposed (512, 128)
    bound1 = 1.0 / jnp.sqrt(512.0)
    w1 = jax.random.uniform(k1, (N_IN, N_HID), jnp.float32, -bound1, bound1)
    b1 = jax.random.uniform(k2, (1, N_HID), jnp.float32, -bound1, bound1)
    # Linear(128, 33): torch weight (33, 128) -> stored transposed (128, 33)
    bound2 = 1.0 / jnp.sqrt(128.0)
    w2 = jax.random.uniform(k3, (N_HID, N_OUT), jnp.float32, -bound2, bound2)
    b2 = jax.random.uniform(k4, (1, N_OUT), jnp.float32, -bound2, bound2)
    return w1, b1, w2, b2


def _reference(x, w1, b1, w2, b2, use_bf16=True):
    """Pure-JAX reference with the same bf16-input / f32-accumulate numerics."""
    if use_bf16:
        x = x.astype(jnp.bfloat16).astype(jnp.float32)
        w1 = w1.astype(jnp.bfloat16).astype(jnp.float32)
        w2 = w2.astype(jnp.bfloat16).astype(jnp.float32)
    h = jnp.maximum(x @ w1 + b1, 0.0)
    if use_bf16:
        h = h.astype(jnp.bfloat16).astype(jnp.float32)
    return h @ w2 + b2


if __name__ == "__main__":
    key = jax.random.PRNGKey(0)
    kx, kp = jax.random.split(key)
    w1, b1, w2, b2 = init_params(kp)

    # Small, sublane-aligned batch (single grid step).
    B = 8
    x = jax.random.normal(kx, (B, N_IN), jnp.float32)
    out = jax.block_until_ready(my_res_model_forward(x, w1, b1, w2, b2))
    ref = _reference(x, w1, b1, w2, b2)
    assert out.shape == (B, N_OUT)
    assert jnp.allclose(out, ref, atol=1e-2, rtol=1e-2)

    # Ragged batch (single partial block, no wrapper-side padding).
    B2 = 13
    x2 = jax.random.normal(jax.random.PRNGKey(1), (B2, N_IN), jnp.float32)
    out2 = jax.block_until_ready(my_res_model_forward(x2, w1, b1, w2, b2))
    ref2 = _reference(x2, w1, b1, w2, b2)
    assert out2.shape == (B2, N_OUT)
    assert jnp.allclose(out2, ref2, atol=1e-2, rtol=1e-2)

    # Multi-step grid with a partial last block (exercises cdiv-grid masking).
    B3 = 40
    x3 = jax.random.normal(jax.random.PRNGKey(2), (B3, N_IN), jnp.float32)
    out3 = jax.block_until_ready(
        my_res_model_forward(x3, w1, b1, w2, b2, tile_b=16))
    ref3 = _reference(x3, w1, b1, w2, b2)
    assert out3.shape == (B3, N_OUT)
    assert jnp.allclose(out3, ref3, atol=1e-2, rtol=1e-2)

    print("KERNEL_OK")
</pallas_src>

<mosaic_0001>
module attributes {stable_mosaic.version = 11 : i64} {
  func.func @_mlp_kernel(%arg0: i32, %arg1: memref<8x512xf32, #tpu.memory_space<vmem>>, %arg2: memref<512x128xbf16, #tpu.memory_space<vmem>>, %arg3: memref<1x128xf32, #tpu.memory_space<vmem>>, %arg4: memref<128x33xbf16, #tpu.memory_space<vmem>>, %arg5: memref<1x33xf32, #tpu.memory_space<vmem>>, %arg6: memref<8x33xf32, #tpu.memory_space<vmem>>) attributes {dimension_semantics = [#tpu.dimension_semantics<parallel>], iteration_bounds = array<i64: 1>, scalar_prefetch = 0 : i64, scratch_operands = 0 : i64, tpu.core_type = #tpu.core_type<tc>, window_params = [{transform_indices = @transform_0, window_bounds = array<i64: 8, 512>}, {pipeline_mode = #tpu.pipeline_mode<synchronous>, transform_indices = @transform_1, window_bounds = array<i64: 512, 128>}, {pipeline_mode = #tpu.pipeline_mode<synchronous>, transform_indices = @transform_2, window_bounds = array<i64: 1, 128>}, {pipeline_mode = #tpu.pipeline_mode<synchronous>, transform_indices = @transform_3, window_bounds = array<i64: 128, 33>}, {pipeline_mode = #tpu.pipeline_mode<synchronous>, transform_indices = @transform_4, window_bounds = array<i64: 1, 33>}, {transform_indices = @transform_5, window_bounds = array<i64: 8, 33>}]} {
    %c0 = arith.constant 0 : index
    %c0_0 = arith.constant 0 : index
    %0 = vector.load %arg1[%c0, %c0_0] : memref<8x512xf32, #tpu.memory_space<vmem>>, vector<8x512xf32>
    %1 = arith.truncf %0 : vector<8x512xf32> to vector<8x512xbf16>
    %c0_1 = arith.constant 0 : index
    %c0_2 = arith.constant 0 : index
    %2 = vector.load %arg2[%c0_1, %c0_2] : memref<512x128xbf16, #tpu.memory_space<vmem>>, vector<512x128xbf16>
    %cst = arith.constant dense<0.000000e+00> : vector<8x128xf32>
    %3 = tpu.matmul %1, %2, %cst {dimension_numbers = #tpu.dot_dimension_numbers<[1], [0], [0], [1], [0, 0, 1, 1], [], []>} : vector<8x512xbf16>, vector<512x128xbf16>, vector<8x128xf32> -> vector<8x128xf32>
    %c0_3 = arith.constant 0 : index
    %c0_4 = arith.constant 0 : index
    %4 = vector.load %arg3[%c0_3, %c0_4] : memref<1x128xf32, #tpu.memory_space<vmem>>, vector<1x128xf32>
    %5 = vector.broadcast %4 : vector<1x128xf32> to vector<8x128xf32>
    %6 = arith.addf %3, %5 : vector<8x128xf32>
    %cst_5 = arith.constant 0.000000e+00 : f32
    %7 = vector.broadcast %cst_5 : f32 to vector<8x128xf32>
    %8 = arith.maximumf %6, %7 : vector<8x128xf32>
    %9 = arith.truncf %8 : vector<8x128xf32> to vector<8x128xbf16>
    %c0_6 = arith.constant 0 : index
    %c0_7 = arith.constant 0 : index
    %10 = vector.load %arg4[%c0_6, %c0_7] : memref<128x33xbf16, #tpu.memory_space<vmem>>, vector<128x33xbf16>
    %cst_8 = arith.constant dense<0.000000e+00> : vector<8x33xf32>
    %11 = tpu.matmul %9, %10, %cst_8 {dimension_numbers = #tpu.dot_dimension_numbers<[1], [0], [0], [1], [0, 0, 1, 1], [], []>} : vector<8x128xbf16>, vector<128x33xbf16>, vector<8x33xf32> -> vector<8x33xf32>
    %c0_9 = arith.constant 0 : index
    %c0_10 = arith.constant 0 : index
    %12 = vector.load %arg5[%c0_9, %c0_10] : memref<1x33xf32, #tpu.memory_space<vmem>>, vector<1x33xf32>
    %13 = vector.broadcast %12 : vector<1x33xf32> to vector<8x33xf32>
    %14 = arith.addf %11, %13 : vector<8x33xf32>
    %c0_11 = arith.constant 0 : index
    %c0_12 = arith.constant 0 : index
    %15 = vector.load %arg6[%c0_11, %c0_12] : memref<8x33xf32, #tpu.memory_space<vmem>>, vector<8x33xf32>
    tpu.vector_store %arg6[%c0_11, %c0_12], %14 {strides = array<i32>} : memref<8x33xf32, #tpu.memory_space<vmem>>, vector<8x33xf32>,
    return
  }
  func.func @transform_0(%arg0: i32) -> (i32, i32) {
    %c0_i32 = arith.constant 0 : i32
    %c0_i32_0 = arith.constant 0 : i32
    return %arg0, %c0_i32 : i32, i32
  }
  func.func @transform_1(%arg0: i32) -> (i32, i32) {
    %c0_i32 = arith.constant 0 : i32
    %c0_i32_0 = arith.constant 0 : i32
    %c0_i32_1 = arith.constant 0 : i32
    return %c0_i32, %c0_i32_0 : i32, i32
  }
  func.func @transform_2(%arg0: i32) -> (i32, i32) {
    %c0_i32 = arith.constant 0 : i32
    %c0_i32_0 = arith.constant 0 : i32
    %c0_i32_1 = arith.constant 0 : i32
    return %c0_i32, %c0_i32_0 : i32, i32
  }
  func.func @transform_3(%arg0: i32) -> (i32, i32) {
    %c0_i32 = arith.constant 0 : i32
    %c0_i32_0 = arith.constant 0 : i32
    %c0_i32_1 = arith.constant 0 : i32
    return %c0_i32, %c0_i32_0 : i32, i32
  }
  func.func @transform_4(%arg0: i32) -> (i32, i32) {
    %c0_i32 = arith.constant 0 : i32
    %c0_i32_0 = arith.constant 0 : i32
    %c0_i32_1 = arith.constant 0 : i32
    return %c0_i32, %c0_i32_0 : i32, i32
  }
  func.func @transform_5(%arg0: i32) -> (i32, i32) {
    %c0_i32 = arith.constant 0 : i32
    %c0_i32_0 = arith.constant 0 : i32
    return %arg0, %c0_i32 : i32, i32
  }
}

</mosaic_0001>

<bundles_post_ra>
// kernel: tpu_custom_call.1
= control target key start
LH: loop header
LB: loop body
LE: loop exit
PB: predicated region body
PF: predicated region fallthrough
CT: control target
= control target key end

     0   :  { %10 = vsyncpa [#allocation3], 0  ;;  %s799_s0 = inlined_call_operand.vmem [shape: f32[8,512], index: 0, kind: input, shape index: {}]   ;;  %s800_s1 = inlined_call_operand.hbm [shape: bf16[512,128], index: 1, kind: input, shape index: {}]   ;;  %s801_s2 = inlined_call_operand.vmem [shape: f32[1,128], index: 2, kind: input, shape index: {}]   ;;  %s802_s3 = inlined_call_operand.vmem [shape: bf16[128,33], index: 3, kind: input, shape index: {}]   ;;  %s803_s4 = inlined_call_operand.vmem [shape: f32[1,33], index: 4, kind: input, shape index: {}]   ;;  %s804_s5 = inlined_call_operand.hbm [shape: f32[8,33], index: 5, kind: output, shape index: {}]  }
   0x1   :  { %11 = vsyncpa [#allocation4], 0  ;;  %s18_s20 = sshll.u32 %s800_s1, 4  ;;  %s717_s21 = smov [#allocation2]   ;;  %s19_s20 = int_to_ptr.hbm [resolvable:$true] %s18_s20 }
   0x2   :  { %s20_s22 = sshll.u32 %s717_s21, 4  ;;  %s718_s23 = smov 64   ;;  %s21_s22 = int_to_ptr.vmem [resolvable:$true] %s20_s22 }
   0x3   :  { %s719_s24 = smov 4  }
   0x4   :  { %26 = dma.hbm_to_vmem [thread:$0]  %s19_s20, 4096, %s21_s22, [#allocation3], %s718_s23, %s718_s23, %s719_s24  }
   0x5   :  { %713 = dma.done.wait [#allocation3], 4096  }
   0x6   :  { %714 = vsyncadd [#allocation3], 4294963200  ;;  %v626_v0 = vld [vmem:[#allocation2 + $0x38] sm:$0xff]  ;;  %v625_v4 = vld [vmem:[#allocation2 + $0x30] sm:$0xff]  ;;  %s449_s27 = sshll.u32 %s804_s5, 4  ;;  %vm440_vm0 = vcmask 269312   ;;  %s450_s27 = int_to_ptr.hbm [resolvable:$true] %s449_s27 }
   0x7   :  { %v634_v1 = vld [vmem:[#allocation2 + $0x78] sm:$0xff]  ;;  %305 = vmatpush.bf16.msra.mxu0 %v626_v0  ;;  %v633_v5 = vld [vmem:[#allocation2 + $0x70] sm:$0xff]  ;;  %v624_v8 = vld [vmem:[#allocation2 + $0x28] sm:$0xff] }
   0x8   :  { %v642_v2 = vld [vmem:[#allocation2 + $0xb8] sm:$0xff]  ;;  %318 = vmatpush.bf16.msra.mxu1 %v634_v1  ;;  %v641_v6 = vld [vmem:[#allocation2 + $0xb0] sm:$0xff]  ;;  %v632_v9 = vld [vmem:[#allocation2 + $0x68] sm:$0xff] }
   0x9   :  { %v650_v3 = vld [vmem:[#allocation2 + $0xf8] sm:$0xff]  ;;  %331 = vmatpush.bf16.msra.mxu2 %v642_v2  ;;  %v649_v7 = vld [vmem:[#allocation2 + $0xf0] sm:$0xff]  ;;  %v640_v10 = vld [vmem:[#allocation2 + $0xa8] sm:$0xff] }
   0xa   :  { %344 = vmatpush.bf16.msra.mxu3 %v650_v3  ;;  %v648_v11 = vld [vmem:[#allocation2 + $0xe8] sm:$0xff]  ;;  %v623_v12 = vld [vmem:[#allocation2 + $0x20] sm:$0xff]  ;;  %v622_v16 = vld [vmem:[#allocation2 + $0x18] sm:$0xff] }
   0xb   :  { %306 = vmatpush.bf16.msra.mxu0 %v625_v4  ;;  %v631_v13 = vld [vmem:[#allocation2 + $0x60] sm:$0xff]  ;;  %v630_v17 = vld [vmem:[#allocation2 + $0x58] sm:$0xff]  ;;  %v621_v20 = vld [vmem:[#allocation2 + $0x10] sm:$0xff] }
   0xc   :  { %319 = vmatpush.bf16.msra.mxu1 %v633_v5  ;;  %v639_v14 = vld [vmem:[#allocation2 + $0xa0] sm:$0xff]  ;;  %v638_v18 = vld [vmem:[#allocation2 + $0x98] sm:$0xff]  ;;  %v629_v21 = vld [vmem:[#allocation2 + $0x50] sm:$0xff] }
   0xd   :  { %332 = vmatpush.bf16.msra.mxu2 %v641_v6  ;;  %v647_v15 = vld [vmem:[#allocation2 + $0xe0] sm:$0xff]  ;;  %v646_v19 = vld [vmem:[#allocation2 + $0xd8] sm:$0xff]  ;;  %v637_v22 = vld [vmem:[#allocation2 + $0x90] sm:$0xff] }
   0xe   :  { %345 = vmatpush.bf16.msra.mxu3 %v649_v7  ;;  %v645_v23 = vld [vmem:[#allocation2 + $0xd0] sm:$0xff]  ;;  %v620_v24 = vld [vmem:[#allocation2 + $0x8] sm:$0xff]  ;;  %v619_v28 = vld [vmem:[#allocation2] sm:$0xff] }
   0xf   :  { %307 = vmatpush.bf16.msra.mxu0 %v624_v8  ;;  %v628_v25 = vld [vmem:[#allocation2 + $0x48] sm:$0xff]  ;;  %v627_v29 = vld [vmem:[#allocation2 + $0x40] sm:$0xff]  ;;  %v39_v34 = vld [vmem:[%s799_s0 + $0x10] sm:$0xff] }
  0x10   :  { %320 = vmatpush.bf16.msra.mxu1 %v632_v9  ;;  %v636_v26 = vld [vmem:[#allocation2 + $0x88] sm:$0xff]  ;;  %v635_v30 = vld [vmem:[#allocation2 + $0x80] sm:$0xff]  ;;  %v40_v35 = vld [vmem:[%s799_s0 + $0x18] sm:$0xff]  ;;  %v43_v39 = vpack.c.bf16 %v39_v34, %v39_v34 }
  0x11   :  { %333 = vmatpush.bf16.msra.mxu2 %v640_v10  ;;  %v644_v27 = vld [vmem:[#allocation2 + $0xc8] sm:$0xff]  ;;  %v37_v31 = vld [vmem:[%s799_s0] sm:$0xff]  ;;  %v658_v36 = vld [vmem:[%s802_s3 + $0x38] sm:$0xff]  ;;  %v44_v40 = vpack.c.bf16 %v40_v35, %v40_v35 }
  0x12   :  { %346 = vmatpush.bf16.msra.mxu3 %v648_v11  ;;  %v38_v32 = vld [vmem:[%s799_s0 + $0x8] sm:$0xff]  ;;  %v643_v33 = vld [vmem:[#allocation2 + $0xc0] sm:$0xff]  ;;  %v41_v37 = vpack.c.bf16 %v37_v31, %v37_v31  ;;  %v657_v41 = vld [vmem:[%s802_s3 + $0x30] sm:$0xff] }
  0x13   :  { %308 = vmatpush.bf16.msra.mxu0 %v623_v12  ;;  %v42_v38 = vpack.c.bf16 %v38_v32, %v38_v32  ;;  %v656_v42 = vld [vmem:[%s802_s3 + $0x28] sm:$0xff]  ;;  %v655_v43 = vld [vmem:[%s802_s3 + $0x20] sm:$0xff]  ;;  %v654_v44 = vld [vmem:[%s802_s3 + $0x18] sm:$0xff] }
  0x14   :  { %321 = vmatpush.bf16.msra.mxu1 %v631_v13  ;;  %v653_v45 = vld [vmem:[%s802_s3 + $0x10] sm:$0xff]  ;;  %v652_v46 = vld [vmem:[%s802_s3 + $0x8] sm:$0xff]  ;;  %v651_v47 = vld [vmem:[%s802_s3] sm:$0xff] }
  0x15   :  { %334 = vmatpush.bf16.msra.mxu2 %v639_v14  ;;  %v663_v48 = vld [vmem:[%s801_s2] ss:$0 sm:$0xff]  ;;  %s720_s2 = smov [#allocation5]  }
  0x16   :  { %347 = vmatpush.bf16.msra.mxu3 %v647_v15  ;;  %v664_v63 = vld [vmem:[%s803_s4] ss:$0 sm:$0xff]  ;;  %s447_s1 = sshll.u32 %s720_s2, 4  ;;  %s448_s1 = int_to_ptr.vmem [resolvable:$true] %s447_s1 }
  0x17   :  { %309 = vmatpush.bf16.msra.mxu0 %v622_v16 }
  0x18   :  { %322 = vmatpush.bf16.msra.mxu1 %v630_v17 }
  0x19   :  { %335 = vmatpush.bf16.msra.mxu2 %v638_v18 }
  0x1a   :  { %348 = vmatpush.bf16.msra.mxu3 %v646_v19 }
  0x1b   :  { %310 = vmatpush.bf16.msra.mxu0 %v621_v20 }
  0x1c   :  { %323 = vmatpush.bf16.msra.mxu1 %v629_v21 }
  0x1d   :  { %336 = vmatpush.bf16.msra.mxu2 %v637_v22 }
  0x1e   :  { %349 = vmatpush.bf16.msra.mxu3 %v645_v23 }
  0x1f   :  { %311 = vmatpush.bf16.msra.mxu0 %v620_v24 }
  0x20   :  { %324 = vmatpush.bf16.msra.mxu1 %v628_v25 }
  0x21   :  { %337 = vmatpush.bf16.msra.mxu2 %v636_v26 }
  0x22   :  { %350 = vmatpush.bf16.msra.mxu3 %v644_v27 }
  0x23   :  { %312 = vmatpush.bf16.msra.mxu0 %v619_v28 }
  0x24   :  { %325 = vmatpush.bf16.msra.mxu1 %v627_v29 }
  0x25   :  { %338 = vmatpush.bf16.msra.mxu2 %v635_v30 }
  0x26   :  { %351 = vmatpush.bf16.msra.mxu3 %v643_v33  ;;  %313 = vmatmul.bf16.vlgmr.msra.gmra.mxu0 %v41_v37 }
  0x27   :  { %427 = vmatpush.bf16.msrb.mxu0 %v658_v36  ;;  %326 = vmatmul.bf16.vlgmr.msra.gmra.mxu1 %v42_v38 }
  0x28   :  { %339 = vmatmul.bf16.vlgmr.msra.gmra.mxu2 %v43_v39 }
  0x29   :  { %352 = vmatmul.bf16.vlgmr.msra.gmra.mxu3 %v44_v40 }
  0x2b   :  { %428 = vmatpush.bf16.msrb.mxu0 %v657_v41 }
  0x2f   :  { %429 = vmatpush.bf16.msrb.mxu0 %v656_v42 }
  0x33   :  { %430 = vmatpush.bf16.msrb.mxu0 %v655_v43 }
  0x37   :  { %431 = vmatpush.bf16.msrb.mxu0 %v654_v44 }
  0x3b   :  { %432 = vmatpush.bf16.msrb.mxu0 %v653_v45 }
  0x3f   :  { %433 = vmatpush.bf16.msrb.mxu0 %v652_v46 }
  0x43   :  { %434 = vmatpush.bf16.msrb.mxu0 %v651_v47 }
  0xa3   :  { %v314_v49 = vpop.f32.mrf.mxu0 }
  0xa4   :  { %v327_v50 = vpop.f32.mrf.mxu1  ;;  %v315_v51 = vadd.f32 %v663_v48, %v314_v49 }
  0xa6   :  { %v328_v52 = vadd.f32 %v327_v50, %v315_v51 }
  0xab   :  { %v340_v53 = vpop.f32.mrf.mxu2  ;;  %v316_v56 = vpop.f32.mrf.mxu0 }
  0xac   :  { %v353_v54 = vpop.f32.mrf.mxu3  ;;  %v341_v55 = vadd.f32 %v340_v53, %v328_v52  ;;  %v329_v57 = vpop.f32.mrf.mxu1 }
  0xae   :  { %v354_v58 = vadd.f32 %v353_v54, %v341_v55 }
  0xb0   :  { %v357_v59 = vmax.f32 %v354_v58, 0.0 }
  0xb2   :  { %v358_v60 = vpack.c.bf16 %v357_v59, %v357_v59 }
  0xb3   :  { %v342_v61 = vpop.f32.mrf.mxu2 }
  0xb4   :  { %v355_v62 = vpop.f32.mrf.mxu3  ;;  %435 = vmatmul.bf16.vlgmr.msrb.gmra.mxu0 %v358_v60 }
 0x131   :  { %v436_v0 = vpop.f32.mrf.mxu0 }
 0x132   :  { %v437_v1 = vadd.f32 %v664_v63, %v436_v0 }
 0x134   :  { %441 = vst.msk [vmem:[#allocation5] sm:$0xff] %vm440_vm0, %v437_v1 }
 0x135   :  { %452 = dma.vmem_to_hbm [thread:$0]  %s448_s1, 128, %s450_s27, [#allocation4]  }
 0x139   :  { %v438_v2 = vpop.f32.mrf.mxu0 }
 0x13a   :  { %715 = dma.done.wait [#allocation4], 128  }
 0x13b   :  { %716 = vsyncadd [#allocation4], 4294967168 }
 0x13c   :  { %457 = vsyncpa [#allocation3], 1 }
 0x13d   :  { %458 = vsyncpa [#allocation4], 1 }

</bundles_post_ra>
